<compile_context>
chip_gen: v7x
topology: tpu7x:2x2x1
jax: 0.10.0
libtpu: 0.0.40
codegen_flags: <defaults>
</compile_context>

<pallas_src>
import jax
import jax.numpy as jnp
from jax.experimental import pallas as pl
from jax.experimental.pallas import tpu as pltpu

NEG_SLOPE = 0.01  # torch.nn.LeakyReLU default negative_slope


def _leaky_relu(v):
    return jnp.where(v > 0, v, NEG_SLOPE * v)


def ann_kernel(x_ref, w_in_ref, b_in_ref, w_h_ref, b_h_ref,
               w_out_ref, b_out_ref, o_ref):
    # Hoist every weight / bias load out of the unrolled loop (single vld +
    # broadcast each instead of 5x for the shared hidden layer).
    x = x_ref[...]
    w_in = w_in_ref[...]
    b_in = b_in_ref[...]
    w_h = w_h_ref[...]
    b_h = b_h_ref[...]
    w_out = w_out_ref[...]
    b_out = b_out_ref[...]

    # input layer
    h = _leaky_relu(jnp.dot(x, w_in, preferred_element_type=jnp.float32) + b_in)
    # hidden layer applied 5 times with the SAME weights (matches PyTorch forward).
    # Kept Python-unrolled on purpose: serial dependent chain, unrolling lets the
    # scheduler overlap bias-add/activation with the next MXU push.
    for _ in range(5):
        h = _leaky_relu(jnp.dot(h, w_h, preferred_element_type=jnp.float32) + b_h)
    # output layer (no activation)
    y = jnp.dot(h, w_out, preferred_element_type=jnp.float32) + b_out
    o_ref[...] = y.astype(o_ref.dtype)


def ann_forward(x, w_in, b_in, w_h, b_h, w_out, b_out, *, batch_tile=128):
    B, in_n = x.shape
    out_n = w_out.shape[1]
    args = (x, w_in, b_in, w_h, b_h, w_out, b_out)

    if B <= batch_tile:
        # Small batch: one invocation, no grid, everything lives in VMEM.
        vmem = pl.BlockSpec(memory_space=pltpu.MemorySpace.VMEM)
        return pl.pallas_call(
            ann_kernel,
            out_shape=jax.ShapeDtypeStruct((B, out_n), x.dtype),
            in_specs=[vmem] * len(args),
            out_specs=vmem,
        )(*args)

    # Large batch: tile the batch axis; weights/biases stay VMEM-resident
    # (constant index_maps) and the batch axis is "parallel" so v7x megacore
    # shards it across both TensorCores.
    n_blocks = pl.cdiv(B, batch_tile)
    Bp = n_blocks * batch_tile
    xp = jnp.pad(x, ((0, Bp - B), (0, 0))) if Bp != B else x

    def resident(a):
        nd = a.ndim
        return pl.BlockSpec(a.shape, lambda i, _nd=nd: (0,) * _nd)

    out = pl.pallas_call(
        ann_kernel,
        out_shape=jax.ShapeDtypeStruct((Bp, out_n), x.dtype),
        grid=(n_blocks,),
        in_specs=[pl.BlockSpec((batch_tile, in_n), lambda i: (i, 0)),
                  resident(w_in), resident(b_in),
                  resident(w_h), resident(b_h),
                  resident(w_out), resident(b_out)],
        out_specs=pl.BlockSpec((batch_tile, out_n), lambda i: (i, 0)),
        compiler_params=pltpu.CompilerParams(
            dimension_semantics=("parallel",)),
    )(xp, w_in, b_in, w_h, b_h, w_out, b_out)
    return out[:B] if Bp != B else out


def init_params(key, in_neuron, hidden_neuron, out_neuron):
    """Deterministic synthetic init (uniform, like torch Linear default scale)."""
    ks = jax.random.split(key, 6)

    def unif(k, shape, fan_in):
        bound = 1.0 / jnp.sqrt(fan_in)
        return jax.random.uniform(k, shape, jnp.float32, -bound, bound)

    w_in = unif(ks[0], (in_neuron, hidden_neuron), in_neuron)
    b_in = unif(ks[1], (1, hidden_neuron), in_neuron)
    w_h = unif(ks[2], (hidden_neuron, hidden_neuron), hidden_neuron)
    b_h = unif(ks[3], (1, hidden_neuron), hidden_neuron)
    w_out = unif(ks[4], (hidden_neuron, out_neuron), hidden_neuron)
    b_out = unif(ks[5], (1, out_neuron), hidden_neuron)
    return w_in, b_in, w_h, b_h, w_out, b_out


def ann_reference(x, w_in, b_in, w_h, b_h, w_out, b_out):
    h = _leaky_relu(x @ w_in + b_in)
    for _ in range(5):
        h = _leaky_relu(h @ w_h + b_h)
    return h @ w_out + b_out


if __name__ == "__main__":
    key = jax.random.PRNGKey(0)
    k_x, k_xl, k_p = jax.random.split(key, 3)

    batch, in_neuron, hidden_neuron, out_neuron = 8, 16, 32, 4
    params = init_params(k_p, in_neuron, hidden_neuron, out_neuron)

    # Small-batch path (no grid, pure VMEM-resident call).
    x = jax.random.normal(k_x, (batch, in_neuron), jnp.float32)
    y = jax.block_until_ready(ann_forward(x, *params))
    y_ref = ann_reference(x, *params)
    assert y.shape == (batch, out_neuron)
    assert jnp.allclose(y, y_ref, atol=1e-5, rtol=1e-5)

    # Large-batch path (batch tiled across a parallel grid, weights resident).
    big_batch = 256
    x_big = jax.random.normal(k_xl, (big_batch, in_neuron), jnp.float32)
    y_big = jax.block_until_ready(ann_forward(x_big, *params))
    y_big_ref = ann_reference(x_big, *params)
    assert y_big.shape == (big_batch, out_neuron)
    assert jnp.allclose(y_big, y_big_ref, atol=1e-5, rtol=1e-5)

    print("KERNEL_OK")
</pallas_src>

<mosaic_0001>
module attributes {stable_mosaic.version = 11 : i64} {
  func.func @ann_kernel(%arg0: memref<8x16xf32, #tpu.memory_space<vmem>>, %arg1: memref<16x32xf32, #tpu.memory_space<vmem>>, %arg2: memref<1x32xf32, #tpu.memory_space<vmem>>, %arg3: memref<32x32xf32, #tpu.memory_space<vmem>>, %arg4: memref<1x32xf32, #tpu.memory_space<vmem>>, %arg5: memref<32x4xf32, #tpu.memory_space<vmem>>, %arg6: memref<1x4xf32, #tpu.memory_space<vmem>>, %arg7: memref<8x4xf32, #tpu.memory_space<vmem>>) attributes {dimension_semantics = [], scalar_prefetch = 0 : i64, scratch_operands = 0 : i64, tpu.core_type = #tpu.core_type<tc>} {
    %c0 = arith.constant 0 : index
    %c0_0 = arith.constant 0 : index
    %0 = vector.load %arg0[%c0, %c0_0] : memref<8x16xf32, #tpu.memory_space<vmem>>, vector<8x16xf32>
    %c0_1 = arith.constant 0 : index
    %c0_2 = arith.constant 0 : index
    %1 = vector.load %arg1[%c0_1, %c0_2] : memref<16x32xf32, #tpu.memory_space<vmem>>, vector<16x32xf32>
    %c0_3 = arith.constant 0 : index
    %c0_4 = arith.constant 0 : index
    %2 = vector.load %arg2[%c0_3, %c0_4] : memref<1x32xf32, #tpu.memory_space<vmem>>, vector<1x32xf32>
    %c0_5 = arith.constant 0 : index
    %c0_6 = arith.constant 0 : index
    %3 = vector.load %arg3[%c0_5, %c0_6] : memref<32x32xf32, #tpu.memory_space<vmem>>, vector<32x32xf32>
    %c0_7 = arith.constant 0 : index
    %c0_8 = arith.constant 0 : index
    %4 = vector.load %arg4[%c0_7, %c0_8] : memref<1x32xf32, #tpu.memory_space<vmem>>, vector<1x32xf32>
    %c0_9 = arith.constant 0 : index
    %c0_10 = arith.constant 0 : index
    %5 = vector.load %arg5[%c0_9, %c0_10] : memref<32x4xf32, #tpu.memory_space<vmem>>, vector<32x4xf32>
    %c0_11 = arith.constant 0 : index
    %c0_12 = arith.constant 0 : index
    %6 = vector.load %arg6[%c0_11, %c0_12] : memref<1x4xf32, #tpu.memory_space<vmem>>, vector<1x4xf32>
    %cst = arith.constant dense<0.000000e+00> : vector<8x32xf32>
    %7 = tpu.matmul %0, %1, %cst {dimension_numbers = #tpu.dot_dimension_numbers<[1], [0], [0], [1], [0, 0, 1, 1], [], []>} : vector<8x16xf32>, vector<16x32xf32>, vector<8x32xf32> -> vector<8x32xf32>
    %8 = vector.broadcast %2 : vector<1x32xf32> to vector<8x32xf32>
    %9 = arith.addf %7, %8 : vector<8x32xf32>
    %cst_13 = arith.constant 0.000000e+00 : f32
    %10 = vector.broadcast %cst_13 : f32 to vector<8x32xf32>
    %11 = arith.cmpf ogt, %9, %10 : vector<8x32xf32>
    %cst_14 = arith.constant 0.00999999977 : f32
    %12 = vector.broadcast %cst_14 : f32 to vector<8x32xf32>
    %13 = arith.mulf %12, %9 : vector<8x32xf32>
    %14 = arith.select %11, %9, %13 : vector<8x32xi1>, vector<8x32xf32>
    %cst_15 = arith.constant dense<0.000000e+00> : vector<8x32xf32>
    %15 = tpu.matmul %14, %3, %cst_15 {dimension_numbers = #tpu.dot_dimension_numbers<[1], [0], [0], [1], [0, 0, 1, 1], [], []>} : vector<8x32xf32>, vector<32x32xf32>, vector<8x32xf32> -> vector<8x32xf32>
    %16 = vector.broadcast %4 : vector<1x32xf32> to vector<8x32xf32>
    %17 = arith.addf %15, %16 : vector<8x32xf32>
    %cst_16 = arith.constant 0.000000e+00 : f32
    %18 = vector.broadcast %cst_16 : f32 to vector<8x32xf32>
    %19 = arith.cmpf ogt, %17, %18 : vector<8x32xf32>
    %cst_17 = arith.constant 0.00999999977 : f32
    %20 = vector.broadcast %cst_17 : f32 to vector<8x32xf32>
    %21 = arith.mulf %20, %17 : vector<8x32xf32>
    %22 = arith.select %19, %17, %21 : vector<8x32xi1>, vector<8x32xf32>
    %cst_18 = arith.constant dense<0.000000e+00> : vector<8x32xf32>
    %23 = tpu.matmul %22, %3, %cst_18 {dimension_numbers = #tpu.dot_dimension_numbers<[1], [0], [0], [1], [0, 0, 1, 1], [], []>} : vector<8x32xf32>, vector<32x32xf32>, vector<8x32xf32> -> vector<8x32xf32>
    %24 = vector.broadcast %4 : vector<1x32xf32> to vector<8x32xf32>
    %25 = arith.addf %23, %24 : vector<8x32xf32>
    %cst_19 = arith.constant 0.000000e+00 : f32
    %26 = vector.broadcast %cst_19 : f32 to vector<8x32xf32>
    %27 = arith.cmpf ogt, %25, %26 : vector<8x32xf32>
    %cst_20 = arith.constant 0.00999999977 : f32
    %28 = vector.broadcast %cst_20 : f32 to vector<8x32xf32>
    %29 = arith.mulf %28, %25 : vector<8x32xf32>
    %30 = arith.select %27, %25, %29 : vector<8x32xi1>, vector<8x32xf32>
    %cst_21 = arith.constant dense<0.000000e+00> : vector<8x32xf32>
    %31 = tpu.matmul %30, %3, %cst_21 {dimension_numbers = #tpu.dot_dimension_numbers<[1], [0], [0], [1], [0, 0, 1, 1], [], []>} : vector<8x32xf32>, vector<32x32xf32>, vector<8x32xf32> -> vector<8x32xf32>
    %32 = vector.broadcast %4 : vector<1x32xf32> to vector<8x32xf32>
    %33 = arith.addf %31, %32 : vector<8x32xf32>
    %cst_22 = arith.constant 0.000000e+00 : f32
    %34 = vector.broadcast %cst_22 : f32 to vector<8x32xf32>
    %35 = arith.cmpf ogt, %33, %34 : vector<8x32xf32>
    %cst_23 = arith.constant 0.00999999977 : f32
    %36 = vector.broadcast %cst_23 : f32 to vector<8x32xf32>
    %37 = arith.mulf %36, %33 : vector<8x32xf32>
    %38 = arith.select %35, %33, %37 : vector<8x32xi1>, vector<8x32xf32>
    %cst_24 = arith.constant dense<0.000000e+00> : vector<8x32xf32>
    %39 = tpu.matmul %38, %3, %cst_24 {dimension_numbers = #tpu.dot_dimension_numbers<[1], [0], [0], [1], [0, 0, 1, 1], [], []>} : vector<8x32xf32>, vector<32x32xf32>, vector<8x32xf32> -> vector<8x32xf32>
    %40 = vector.broadcast %4 : vector<1x32xf32> to vector<8x32xf32>
    %41 = arith.addf %39, %40 : vector<8x32xf32>
    %cst_25 = arith.constant 0.000000e+00 : f32
    %42 = vector.broadcast %cst_25 : f32 to vector<8x32xf32>
    %43 = arith.cmpf ogt, %41, %42 : vector<8x32xf32>
    %cst_26 = arith.constant 0.00999999977 : f32
    %44 = vector.broadcast %cst_26 : f32 to vector<8x32xf32>
    %45 = arith.mulf %44, %41 : vector<8x32xf32>
    %46 = arith.select %43, %41, %45 : vector<8x32xi1>, vector<8x32xf32>
    %cst_27 = arith.constant dense<0.000000e+00> : vector<8x32xf32>
    %47 = tpu.matmul %46, %3, %cst_27 {dimension_numbers = #tpu.dot_dimension_numbers<[1], [0], [0], [1], [0, 0, 1, 1], [], []>} : vector<8x32xf32>, vector<32x32xf32>, vector<8x32xf32> -> vector<8x32xf32>
    %48 = vector.broadcast %4 : vector<1x32xf32> to vector<8x32xf32>
    %49 = arith.addf %47, %48 : vector<8x32xf32>
    %cst_28 = arith.constant 0.000000e+00 : f32
    %50 = vector.broadcast %cst_28 : f32 to vector<8x32xf32>
    %51 = arith.cmpf ogt, %49, %50 : vector<8x32xf32>
    %cst_29 = arith.constant 0.00999999977 : f32
    %52 = vector.broadcast %cst_29 : f32 to vector<8x32xf32>
    %53 = arith.mulf %52, %49 : vector<8x32xf32>
    %54 = arith.select %51, %49, %53 : vector<8x32xi1>, vector<8x32xf32>
    %cst_30 = arith.constant dense<0.000000e+00> : vector<8x4xf32>
    %55 = tpu.matmul %54, %5, %cst_30 {dimension_numbers = #tpu.dot_dimension_numbers<[1], [0], [0], [1], [0, 0, 1, 1], [], []>} : vector<8x32xf32>, vector<32x4xf32>, vector<8x4xf32> -> vector<8x4xf32>
    %56 = vector.broadcast %6 : vector<1x4xf32> to vector<8x4xf32>
    %57 = arith.addf %55, %56 : vector<8x4xf32>
    %c0_31 = arith.constant 0 : index
    %c0_32 = arith.constant 0 : index
    %58 = vector.load %arg7[%c0_31, %c0_32] : memref<8x4xf32, #tpu.memory_space<vmem>>, vector<8x4xf32>
    tpu.vector_store %arg7[%c0_31, %c0_32], %57 {strides = array<i32>} : memref<8x4xf32, #tpu.memory_space<vmem>>, vector<8x4xf32>,
    return
  }
}

</mosaic_0001>

<bundles_post_ra>
// kernel: tpu_custom_call.1
= control target key start
LH: loop header
LB: loop body
LE: loop exit
PB: predicated region body
PF: predicated region fallthrough
CT: control target
= control target key end

     0   :  { %12 = vsyncpa [#allocation3], 0  ;;  %s795_s24 = smov [#allocation2]   ;;  %s925_s0 = inlined_call_operand.vmem [shape: f32[8,16], index: 0, kind: input, shape index: {}]   ;;  %s926_s1 = inlined_call_operand.hbm [shape: f32[16,32], index: 1, kind: input, shape index: {}]   ;;  %s927_s2 = inlined_call_operand.vmem [shape: f32[1,32], index: 2, kind: input, shape index: {}]   ;;  %s928_s3 = inlined_call_operand.vmem [shape: f32[32,32], index: 3, kind: input, shape index: {}]   ;;  %s929_s4 = inlined_call_operand.vmem [shape: f32[1,32], index: 4, kind: input, shape index: {}]   ;;  %s930_s5 = inlined_call_operand.vmem [shape: f32[32,4], index: 5, kind: input, shape index: {}]   ;;  %s931_s6 = inlined_call_operand.vmem [shape: f32[1,4], index: 6, kind: input, shape index: {}]   ;;  %s932_s7 = inlined_call_operand.vmem [shape: f32[8,4], index: 7, kind: output, shape index: {}]  }
   0x1   :  { %s20_s25 = sshll.u32 %s795_s24, 4  ;;  %s771_s28 = scalar_lea.hbm %s926_s1, 256  ;;  %s21_s25 = int_to_ptr.vmem [resolvable:$true] %s20_s25 }
   0x2   :  { %p772_p0 = scmp.ne.s32.totalorder %s926_s1, %s771_s28  ;;  %p775_p1 = scmp.lt.u32.totalorder %s771_s28, %s926_s1 }
   0x4   :  { %p777_p2 = pnand %p775_p1, %p772_p0 }
   0x6   :  { %780 = shalt.err (!%p777_p2)
}
   0x7   :  { %s781_s10 = scalar_lea.vmem %s21_s25, 256  ;;  %p786_p4 = scmp.lt.s32.totalorder %s21_s25, %s21_s25 }
   0x8   :  { %p782_p3 = scmp.ne.s32.totalorder %s21_s25, %s781_s10  ;;  %p787_p5 = scmp.lt.s32.totalorder %s781_s10, %s781_s10 }
   0xa   :  { %p788_p6 = por %p787_p5, %p786_p4 }
   0xc   :  { %p789_p7 = pnand %p788_p6, %p782_p3 }
   0xe   :  { %792 = shalt.err (!%p789_p7)
}
   0xf   :  { %s796_s11 = smov 128   ;;  %s797_s12 = smov 8  }
  0x10   :  { %26 = dma.hbm_to_vmem [thread:$0]  %s926_s1, 256, %s21_s25, [#allocation3], %s796_s11, %s796_s11, %s797_s12  }
  0x11   :  { %793 = dma.done.wait [#allocation3], 256  }
  0x12   :  { %794 = vsyncadd [#allocation3], 4294967040  ;;  %v798_v0 = vmov 0.0|0.0   ;;  %vm799_vm0 = vmmov 0   ;;  %v800_v1 = vmov 0.0   ;;  %v41_v2 = vld [vmem:[#allocation2] sm:$0xff] }
  0x13   :  { %726 = vmatprep.subr.bf16.mxu0 %v798_v0  ;;  %657 = vmatprep.mubr.msk.f32.mxu0 %vm799_vm0, %v800_v1  ;;  %v42_v3 = vld [vmem:[#allocation2 + $0x8] sm:$0xff]  ;;  %v44_v5 = vld [vmem:[%s928_s3] sm:$0xff]  ;;  %vm60_vm1 = vcmask 130048   ;;  %v46_v9 = vld [vmem:[%s928_s3 + $0x10] sm:$0xff]  ;;  %vm143_vm3 = vcmask 261120   ;;  %vm603_vm9 = vcmask 31744  }
  0x14   :  { %729 = vmatprep.subr.bf16.mxu1 %v798_v0  ;;  %668 = vmatprep.mubr.msk.f32.mxu1 %vm799_vm0, %v800_v1  ;;  %v727_v4 = vpack.c.bf16 %v42_v3, %v41_v2  ;;  %v45_v6 = vld [vmem:[%s928_s3 + $0x8] sm:$0xff]  ;;  %v40_v8 = vld [vmem:[%s925_s0] sm:$0xff]  ;;  %v47_v10 = vld [vmem:[%s928_s3 + $0x18] sm:$0xff] }
  0x15   :  { %v730_v7 = vpack.c.bf16 %v45_v6, %v44_v5  ;;  %v733_v11 = vpack.c.bf16 %v47_v10, %v46_v9  ;;  %v610_v12 = vld [vmem:[%s927_s2] ss:$0 sm:$0xff]  ;;  %v50_v35 = vld [vmem:[%s930_s5 + $0x8] sm:$0xff]  ;;  %v51_v42 = vld [vmem:[%s930_s5 + $0x10] sm:$0xff] }
  0x16   :  { %728 = vmatpush3.bf16.msra.mxu0 %v727_v4  ;;  %v612_v18 = vld [vmem:[%s929_s4] ss:$0 sm:$0xff]  ;;  %v52_v43 = vld [vmem:[%s930_s5 + $0x18] sm:$0xff] }
  0x17   :  { %731 = vmatpush3.bf16.msra.mxu1 %v730_v7  ;;  %735 = vmatprep.subr.bf16.mxu0 %v798_v0  ;;  %v49_v34 = vld [vmem:[%s930_s5] sm:$0xff]  ;;  %v763_v44 = vpack.c.bf16 %v52_v43, %v51_v42 }
  0x18   :  { %732 = vmatprep.subr.bf16.mxu1 %v798_v0  ;;  %v760_v36 = vpack.c.bf16 %v50_v35, %v49_v34  ;;  %v618_v50 = vld [vmem:[%s931_s6] ss:$0 sm:$0xff] }
  0x19   :  { %658 = vmatmul.mubr.msk.f32.vlgmr.msra.gmra.mrb[0].mxu0 %vm60_vm1, %v40_v8 }
  0x1a   :  { %737 = vmatpush3.bf16.msra.mxu0 %v730_v7  ;;  %679 = vmatprep.mubr.msk.f32.mxu0 %vm799_vm0, %v800_v1 }
  0x1b   :  { %738 = vmatprep.subr.bf16.mxu0 %v798_v0  ;;  %734 = vmatpush3.bf16.msra.mxu1 %v733_v11 }
  0x1c   :  { %741 = vmatprep.subr.bf16.mxu1 %v798_v0 }
  0x1e   :  { %740 = vmatpush3.bf16.msra.mxu0 %v733_v11 }
  0x1f   :  { %747 = vmatprep.subr.bf16.mxu0 %v798_v0 }
  0xec   :  { %v130_v13 = vpop.f32.mrb[0].mxu0 }
  0xed   :  { %v131_v14 = vadd.f32 %v610_v12, %v130_v13  ;;  %v659_v15 = vpop.f32.mrb[1].mxu0 }
  0xef   :  { %vm134_vm2 = vcmp.gt.f32.partialorder %v131_v14, 0.0  ;;  %v135_v16 = vmul.f32 0.01, %v131_v14 }
  0xf1   :  { %v136_v17 = vsel %vm134_vm2, %v131_v14, %v135_v16 }
  0xf2   :  { %669 = vmatmul.mubr.msk.f32.vlgmr.msra.gmra.mrb[0].mxu1 %vm143_vm3, %v136_v17 }
  0xf3   :  { %743 = vmatpush3.bf16.msra.mxu1 %v730_v7  ;;  %690 = vmatprep.mubr.msk.f32.mxu1 %vm799_vm0, %v800_v1 }
  0xf4   :  { %744 = vmatprep.subr.bf16.mxu1 %v798_v0 }
  0xf7   :  { %746 = vmatpush3.bf16.msra.mxu1 %v733_v11 }
  0xf8   :  { %753 = vmatprep.subr.bf16.mxu1 %v798_v0 }
 0x1c5   :  { %v213_v19 = vpop.f32.mrb[0].mxu1 }
 0x1c6   :  { %v214_v20 = vadd.f32 %v612_v18, %v213_v19  ;;  %v670_v21 = vpop.f32.mrb[1].mxu1 }
 0x1c8   :  { %vm217_vm4 = vcmp.gt.f32.partialorder %v214_v20, 0.0  ;;  %v218_v22 = vmul.f32 0.01, %v214_v20 }
 0x1ca   :  { %v219_v23 = vsel %vm217_vm4, %v214_v20, %v218_v22 }
 0x1cb   :  { %680 = vmatmul.mubr.msk.f32.vlgmr.msra.gmra.mrb[2].mxu0 %vm143_vm3, %v219_v23 }
 0x1cc   :  { %749 = vmatpush3.bf16.msra.mxu0 %v730_v7  ;;  %701 = vmatprep.mubr.msk.f32.mxu0 %vm799_vm0, %v800_v1 }
 0x1cd   :  { %750 = vmatprep.subr.bf16.mxu0 %v798_v0 }
 0x1d0   :  { %752 = vmatpush3.bf16.msra.mxu0 %v733_v11 }
 0x1d1   :  { %759 = vmatprep.subr.bf16.mxu0 %v798_v0 }
 0x29e   :  { %v289_v24 = vpop.f32.mrb[2].mxu0 }
 0x29f   :  { %v290_v25 = vadd.f32 %v612_v18, %v289_v24  ;;  %v681_v26 = vpop.f32.mrb[3].mxu0 }
 0x2a1   :  { %vm293_vm5 = vcmp.gt.f32.partialorder %v290_v25, 0.0  ;;  %v294_v27 = vmul.f32 0.01, %v290_v25 }
 0x2a3   :  { %v295_v28 = vsel %vm293_vm5, %v290_v25, %v294_v27 }
 0x2a4   :  { %691 = vmatmul.mubr.msk.f32.vlgmr.msra.gmra.mrb[2].mxu1 %vm143_vm3, %v295_v28 }
 0x2a5   :  { %755 = vmatpush3.bf16.msra.mxu1 %v730_v7  ;;  %712 = vmatprep.mubr.msk.f32.mxu1 %vm799_vm0, %v800_v1 }
 0x2a6   :  { %756 = vmatprep.subr.bf16.mxu1 %v798_v0 }
 0x2a9   :  { %758 = vmatpush3.bf16.msra.mxu1 %v733_v11 }
 0x377   :  { %v365_v29 = vpop.f32.mrb[2].mxu1 }
 0x378   :  { %v366_v30 = vadd.f32 %v612_v18, %v365_v29  ;;  %v692_v31 = vpop.f32.mrb[3].mxu1 }
 0x37a   :  { %vm369_vm6 = vcmp.gt.f32.partialorder %v366_v30, 0.0  ;;  %v370_v32 = vmul.f32 0.01, %v366_v30 }
 0x37c   :  { %v371_v33 = vsel %vm369_vm6, %v366_v30, %v370_v32 }
 0x37d   :  { %702 = vmatmul.mubr.msk.f32.vlgmr.msra.gmra.mrb[4].mxu0 %vm143_vm3, %v371_v33 }
 0x37e   :  { %723 = vmatprep.mubr.msk.f32.mxu0 %vm799_vm0, %v800_v1  ;;  %761 = vmatpush3.bf16.msra.mxu0 %v760_v36 }
 0x37f   :  { %762 = vmatprep.subr.bf16.mxu0 %v798_v0 }
 0x382   :  { %764 = vmatpush3.bf16.msra.mxu0 %v763_v44 }
 0x450   :  { %v441_v37 = vpop.f32.mrb[4].mxu0 }
 0x451   :  { %v442_v38 = vadd.f32 %v612_v18, %v441_v37  ;;  %v703_v39 = vpop.f32.mrb[5].mxu0 }
 0x453   :  { %vm445_vm7 = vcmp.gt.f32.partialorder %v442_v38, 0.0  ;;  %v446_v40 = vmul.f32 0.01, %v442_v38 }
 0x455   :  { %v447_v41 = vsel %vm445_vm7, %v442_v38, %v446_v40 }
 0x456   :  { %713 = vmatmul.mubr.msk.f32.vlgmr.msra.gmra.mrb[4].mxu1 %vm143_vm3, %v447_v41 }
 0x529   :  { %v517_v45 = vpop.f32.mrb[4].mxu1 }
 0x52a   :  { %v518_v46 = vadd.f32 %v612_v18, %v517_v45  ;;  %v714_v47 = vpop.f32.mrb[5].mxu1 }
 0x52c   :  { %vm521_vm8 = vcmp.gt.f32.partialorder %v518_v46, 0.0  ;;  %v522_v48 = vmul.f32 0.01, %v518_v46 }
 0x52e   :  { %v523_v49 = vsel %vm521_vm8, %v518_v46, %v522_v48 }
 0x52f   :  { %724 = vmatmul.mubr.msk.f32.vlgmr.msra.gmra.mrb[6].mxu0 %vm143_vm3, %v523_v49 }
 0x602   :  { %v599_v51 = vpop.f32.mrb[6].mxu0 }
 0x603   :  { %v600_v52 = vadd.f32 %v618_v50, %v599_v51  ;;  %v725_v53 = vpop.f32.mrb[7].mxu0 }
 0x605   :  { %604 = vst.msk [vmem:[%s932_s7] sm:$0xff] %vm603_vm9, %v600_v52 }
 0x606   :  { %609 = vsyncpa [#allocation3], 1 }

</bundles_post_ra>
